<compile_context>
chip_gen: v7x
topology: tpu7x:2x2x1
jax: 0.10.0
libtpu: 0.0.40
codegen_flags: <defaults>
</compile_context>

<pallas_src>
import jax
import jax.numpy as jnp
from jax.experimental import pallas as pl
from jax.experimental.pallas import tpu as pltpu

EPS = 1e-5


def _decoder_kernel(z_ref, wt_ref, gb_ref, o_ref):
    # Linear (bias dropped: training-mode BatchNorm cancels it exactly).
    y = jnp.dot(z_ref[...], wt_ref[...], preferred_element_type=jnp.float32)

    # One-pass batch statistics over the batch axis (per output feature).
    inv_b = 1.0 / y.shape[0]
    mean = jnp.sum(y, axis=0, keepdims=True) * inv_b
    ex2 = jnp.sum(y * y, axis=0, keepdims=True) * inv_b
    var = jnp.maximum(ex2 - mean * mean, 0.0)  # guard tiny negative fp error

    # Fold BN into a single per-feature scale/shift: out = y*scale + shift.
    scale = gb_ref[0:1, :] * jax.lax.rsqrt(var + EPS)
    shift = gb_ref[1:2, :] - mean * scale
    o_ref[...] = y * scale + shift


def _round_up(x, m):
    return ((x + m - 1) // m) * m


def teamwork_situation_decoder(z, w_t, b, gamma, beta, primary_layer_dims,
                               *, tile_n=512):
    """Forward pass of TeamworkSituationDecoder.

    z     : (B, H) float32
    w_t   : (H, TOTAL)  pre-transposed Linear weight (TOTAL = sum din*dout)
    b     : (TOTAL,)    Linear bias (unused: training-mode BN cancels it)
    gamma : (TOTAL,)    BN weight
    beta  : (TOTAL,)    BN bias
    Returns (B, dout0, din0) for the first primary layer (matches the module,
    which only ever keeps params[0]).
    """
    del b  # mathematically a no-op under training-mode BatchNorm
    B, H = z.shape
    din0, dout0 = primary_layer_dims[0]
    keep = din0 * dout0

    # Only compute the kept columns, rounded up to 128 for unmasked vst.
    width = _round_up(keep, 128)

    # Clamp the column tile so the double-buffered working set stays inside a
    # budget safe for v7x's 64 MiB VMEM (and v5e/v6e scoped defaults).
    tile = max(128, (int(tile_n) // 128) * 128)
    fixed = 2 * B * H * 4                      # double-buffered z
    per_col = 2 * (H + B + 2) * 4              # W^T tile + out tile + gamma/beta
    budget = 24 << 20
    while tile > 128 and fixed + per_col * tile > budget:
        tile -= 128
    tile = min(tile, width)
    grid_n = pl.cdiv(width, tile)
    width_pad = grid_n * tile

    # Slice away unused trailing parameters; zero-pad to the tiled width
    # (padded columns produce finite garbage that is sliced off below).
    w_keep = w_t[:, :keep]
    g_keep = gamma[:keep]
    be_keep = beta[:keep]
    if width_pad > keep:
        pad = width_pad - keep
        w_keep = jnp.pad(w_keep, ((0, 0), (0, pad)))
        g_keep = jnp.pad(g_keep, (0, pad))
        be_keep = jnp.pad(be_keep, (0, pad))
    gb = jnp.stack([g_keep, be_keep], axis=0)  # (2, width_pad): one DMA stream

    vmem_limit = int(min(100 << 20,
                         max(32 << 20, 4 * (fixed + per_col * tile) + (8 << 20))))

    flat = pl.pallas_call(
        _decoder_kernel,
        out_shape=jax.ShapeDtypeStruct((B, width_pad), jnp.float32),
        grid_spec=pltpu.PrefetchScalarGridSpec(
            num_scalar_prefetch=0,
            grid=(grid_n,),
            in_specs=[
                pl.BlockSpec((B, H), lambda j: (0, 0)),        # z (full batch)
                pl.BlockSpec((H, tile), lambda j: (0, j)),     # W^T column tile
                pl.BlockSpec((2, tile), lambda j: (0, j)),     # packed gamma/beta
            ],
            out_specs=pl.BlockSpec((B, tile), lambda j: (0, j)),
        ),
        compiler_params=pltpu.CompilerParams(
            dimension_semantics=("parallel",),
            vmem_limit_bytes=vmem_limit),
    )(z, w_keep, gb)

    # Glue: drop padding, reshape to (B, dout0, din0).
    return flat[:, :keep].reshape(B, dout0, din0)


def _reference(z, w_t, b, gamma, beta, primary_layer_dims):
    # Faithful (bias-carrying, two-pass-variance) reference.
    y = z @ w_t + b
    mean = y.mean(axis=0, keepdims=True)
    var = ((y - mean) ** 2).mean(axis=0, keepdims=True)
    y = (y - mean) / jnp.sqrt(var + EPS) * gamma + beta
    din0, dout0 = primary_layer_dims[0]
    return y[:, : din0 * dout0].reshape(z.shape[0], dout0, din0)


if __name__ == "__main__":
    # Small shapes consistent with the module.
    B = 2
    hyper_input_dim = 32
    primary_layer_dims = [(8, 16), (16, 8)]                 # (dim_in, dim_out)
    total = sum(d[0] * d[1] for d in primary_layer_dims)    # 128 + 128 = 256

    key = jax.random.PRNGKey(0)
    kz, kw, kb = jax.random.split(key, 3)

    z = jax.random.normal(kz, (B, hyper_input_dim), dtype=jnp.float32)

    # Deterministic parameter init (Linear weight stored pre-transposed).
    w_t = jax.random.normal(kw, (hyper_input_dim, total), dtype=jnp.float32)
    w_t = w_t * (1.0 / jnp.sqrt(hyper_input_dim))
    b = jax.random.normal(kb, (total,), dtype=jnp.float32) * 0.01
    gamma = jnp.ones((total,), dtype=jnp.float32)            # BN default init
    beta = jnp.zeros((total,), dtype=jnp.float32)

    out = teamwork_situation_decoder(z, w_t, b, gamma, beta,
                                     primary_layer_dims)
    out = jax.block_until_ready(out)

    ref = _reference(z, w_t, b, gamma, beta, primary_layer_dims)
    assert out.shape == (B, primary_layer_dims[0][1], primary_layer_dims[0][0])
    assert jnp.allclose(out, ref, atol=1e-4, rtol=1e-4), "mismatch vs reference"

    print("KERNEL_OK")
</pallas_src>

<mosaic_0001>
module attributes {stable_mosaic.version = 11 : i64} {
  func.func @_decoder_kernel(%arg0: i32, %arg1: memref<2x32xf32, #tpu.memory_space<vmem>>, %arg2: memref<32x128xf32, #tpu.memory_space<vmem>>, %arg3: memref<2x128xf32, #tpu.memory_space<vmem>>, %arg4: memref<2x128xf32, #tpu.memory_space<vmem>>) attributes {dimension_semantics = [#tpu.dimension_semantics<parallel>], iteration_bounds = array<i64: 1>, scalar_prefetch = 0 : i64, scratch_operands = 0 : i64, tpu.core_type = #tpu.core_type<tc>, window_params = [{pipeline_mode = #tpu.pipeline_mode<synchronous>, transform_indices = @transform_0, window_bounds = array<i64: 2, 32>}, {transform_indices = @transform_1, window_bounds = array<i64: 32, 128>}, {transform_indices = @transform_2, window_bounds = array<i64: 2, 128>}, {transform_indices = @transform_3, window_bounds = array<i64: 2, 128>}]} {
    %c0 = arith.constant 0 : index
    %c0_0 = arith.constant 0 : index
    %0 = vector.load %arg1[%c0, %c0_0] : memref<2x32xf32, #tpu.memory_space<vmem>>, vector<2x32xf32>
    %c0_1 = arith.constant 0 : index
    %c0_2 = arith.constant 0 : index
    %1 = vector.load %arg2[%c0_1, %c0_2] : memref<32x128xf32, #tpu.memory_space<vmem>>, vector<32x128xf32>
    %cst = arith.constant dense<0.000000e+00> : vector<2x128xf32>
    %2 = tpu.matmul %0, %1, %cst {dimension_numbers = #tpu.dot_dimension_numbers<[1], [0], [0], [1], [0, 0, 1, 1], [], []>} : vector<2x32xf32>, vector<32x128xf32>, vector<2x128xf32> -> vector<2x128xf32>
    %cst_3 = arith.constant dense<0.000000e+00> : vector<128xf32>
    %3 = vector.multi_reduction <add>, %2, %cst_3 [0] : vector<2x128xf32> to vector<128xf32>
    %4 = vector.shape_cast %3 : vector<128xf32> to vector<1x128xf32>
    %cst_4 = arith.constant 5.000000e-01 : f32
    %5 = vector.broadcast %cst_4 : f32 to vector<1x128xf32>
    %6 = arith.mulf %4, %5 : vector<1x128xf32>
    %7 = arith.mulf %2, %2 : vector<2x128xf32>
    %cst_5 = arith.constant dense<0.000000e+00> : vector<128xf32>
    %8 = vector.multi_reduction <add>, %7, %cst_5 [0] : vector<2x128xf32> to vector<128xf32>
    %9 = vector.shape_cast %8 : vector<128xf32> to vector<1x128xf32>
    %cst_6 = arith.constant 5.000000e-01 : f32
    %10 = vector.broadcast %cst_6 : f32 to vector<1x128xf32>
    %11 = arith.mulf %9, %10 : vector<1x128xf32>
    %12 = arith.mulf %6, %6 : vector<1x128xf32>
    %13 = arith.subf %11, %12 : vector<1x128xf32>
    %cst_7 = arith.constant 0.000000e+00 : f32
    %14 = vector.broadcast %cst_7 : f32 to vector<1x128xf32>
    %15 = arith.maximumf %13, %14 : vector<1x128xf32>
    %c0_8 = arith.constant 0 : index
    %c0_9 = arith.constant 0 : index
    %16 = vector.load %arg3[%c0_8, %c0_9] : memref<2x128xf32, #tpu.memory_space<vmem>>, vector<1x128xf32>
    %cst_10 = arith.constant 9.99999974E-6 : f32
    %17 = vector.broadcast %cst_10 : f32 to vector<1x128xf32>
    %18 = arith.addf %15, %17 : vector<1x128xf32>
    %19 = math.rsqrt %18 : vector<1x128xf32>
    %20 = arith.mulf %16, %19 : vector<1x128xf32>
    %c1 = arith.constant 1 : index
    %c0_11 = arith.constant 0 : index
    %21 = vector.load %arg3[%c1, %c0_11] : memref<2x128xf32, #tpu.memory_space<vmem>>, vector<1x128xf32>
    %22 = arith.mulf %6, %20 : vector<1x128xf32>
    %23 = arith.subf %21, %22 : vector<1x128xf32>
    %24 = vector.broadcast %20 : vector<1x128xf32> to vector<2x128xf32>
    %25 = arith.mulf %2, %24 : vector<2x128xf32>
    %26 = vector.broadcast %23 : vector<1x128xf32> to vector<2x128xf32>
    %27 = arith.addf %25, %26 : vector<2x128xf32>
    %c0_12 = arith.constant 0 : index
    %c0_13 = arith.constant 0 : index
    %28 = vector.load %arg4[%c0_12, %c0_13] : memref<2x128xf32, #tpu.memory_space<vmem>>, vector<2x128xf32>
    tpu.vector_store %arg4[%c0_12, %c0_13], %27 {strides = array<i32>} : memref<2x128xf32, #tpu.memory_space<vmem>>, vector<2x128xf32>,
    return
  }
  func.func @transform_0(%arg0: i32) -> (i32, i32) {
    %c0_i32 = arith.constant 0 : i32
    %c0_i32_0 = arith.constant 0 : i32
    %c0_i32_1 = arith.constant 0 : i32
    return %c0_i32, %c0_i32_0 : i32, i32
  }
  func.func @transform_1(%arg0: i32) -> (i32, i32) {
    %c0_i32 = arith.constant 0 : i32
    %c0_i32_0 = arith.constant 0 : i32
    return %c0_i32, %arg0 : i32, i32
  }
  func.func @transform_2(%arg0: i32) -> (i32, i32) {
    %c0_i32 = arith.constant 0 : i32
    %c0_i32_0 = arith.constant 0 : i32
    return %c0_i32, %arg0 : i32, i32
  }
  func.func @transform_3(%arg0: i32) -> (i32, i32) {
    %c0_i32 = arith.constant 0 : i32
    %c0_i32_0 = arith.constant 0 : i32
    return %c0_i32, %arg0 : i32, i32
  }
}

</mosaic_0001>

<bundles_post_ra>
// kernel: tpu_custom_call.1
= control target key start
LH: loop header
LB: loop body
LE: loop exit
PB: predicated region body
PF: predicated region fallthrough
CT: control target
= control target key end

     0   :  { %8 = vsyncpa [#allocation3], 0  ;;  %s357_s0 = inlined_call_operand.hbm [shape: f32[2,32], index: 0, kind: input, shape index: {}]   ;;  %s358_s1 = inlined_call_operand.hbm [shape: f32[32,128], index: 1, kind: input, shape index: {}]   ;;  %s359_s2 = inlined_call_operand.vmem [shape: f32[2,128], index: 2, kind: input, shape index: {}]   ;;  %s360_s3 = inlined_call_operand.hbm [shape: f32[2,128], index: 3, kind: output, shape index: {}]  }
   0x1   :  { %9 = vsyncpa [#allocation6], 0 }
   0x2   :  { %10 = vsyncpa [#allocation4], 0  ;;  %s280_s12 = smov [#allocation2]   ;;  %s281_s14 = smov [#allocation5]  }
   0x3   :  { %s17_s13 = sshll.u32 %s280_s12, 4  ;;  %s26_s15 = sshll.u32 %s281_s14, 4  ;;  %s18_s13 = int_to_ptr.vmem [resolvable:$true] %s17_s13  ;;  %s308_s15 = int_to_ptr.vmem [resolvable:$true] %s26_s15 }
   0x4   :  { %s208_s18 = scalar_lea.hbm %s357_s0, 32 }
   0x5   :  { %p209_p0 = scmp.ne.s32.totalorder %s357_s0, %s208_s18  ;;  %p212_p1 = scmp.lt.u32.totalorder %s208_s18, %s357_s0 }
   0x7   :  { %p214_p2 = pnand %p212_p1, %p209_p0 }
   0x9   :  { %217 = shalt.err (!%p214_p2)
}
   0xa   :  { %s218_s23 = scalar_lea.vmem %s18_s13, 32  ;;  %p223_p4 = scmp.lt.s32.totalorder %s18_s13, %s18_s13 }
   0xb   :  { %p219_p3 = scmp.ne.s32.totalorder %s18_s13, %s218_s23  ;;  %p224_p5 = scmp.lt.s32.totalorder %s218_s23, %s218_s23 }
   0xd   :  { %p225_p6 = por %p224_p5, %p223_p4 }
   0xf   :  { %p226_p7 = pnand %p225_p6, %p219_p3 }
  0x11   :  { %229 = shalt.err (!%p226_p7)
}
  0x12   :  { %20 = dma.hbm_to_vmem [thread:$0]  %s357_s0, 32, %s18_s13, [#allocation3]  }
  0x13   :  { %s230_s28 = scalar_lea.hbm %s358_s1, 512 }
  0x14   :  { %p231_p8 = scmp.ne.s32.totalorder %s358_s1, %s230_s28  ;;  %p234_p9 = scmp.lt.u32.totalorder %s230_s28, %s358_s1 }
  0x16   :  { %p236_p10 = pnand %p234_p9, %p231_p8 }
  0x18   :  { %239 = shalt.err (!%p236_p10)
}
  0x19   :  { %s240_s6 = scalar_lea.vmem %s308_s15, 512  ;;  %p245_p12 = scmp.lt.s32.totalorder %s308_s15, %s308_s15 }
  0x1a   :  { %p241_p11 = scmp.ne.s32.totalorder %s308_s15, %s240_s6  ;;  %p246_p13 = scmp.lt.s32.totalorder %s240_s6, %s240_s6 }
  0x1c   :  { %p247_p0 = por %p246_p13, %p245_p12 }
  0x1e   :  { %p248_p1 = pnand %p247_p0, %p241_p11 }
  0x20   :  { %251 = shalt.err (!%p248_p1)
}
  0x21   :  { %s282_s0 = smov 128   ;;  %s283_s7 = smov 8  }
  0x22   :  { %32 = dma.hbm_to_vmem [thread:$0]  %s358_s1, 512, %s308_s15, [#allocation6], %s282_s0, %s282_s0, %s283_s7  }
  0x23   :  { %274 = dma.done.wait [#allocation3], 32  }
  0x24   :  { %275 = vsyncadd [#allocation3], 4294967264 }
  0x25   :  { %276 = dma.done.wait [#allocation6], 512  }
  0x26   :  { %277 = vsyncadd [#allocation6], 4294966784  ;;  %v284_v0 = vmov 0.0|0.0   ;;  %vm285_vm0 = vmmov 0   ;;  %v286_v1 = vmov 0.0   ;;  %v42_v2 = vld [vmem:[#allocation5] sm:$0xff]  ;;  %v148_v32 = vlaneseq }
  0x27   :  { %192 = vmatprep.subr.bf16.mxu0 %v284_v0  ;;  %189 = vmatprep.mubr.msk.f32.mxu0 %vm285_vm0, %v286_v1  ;;  %v43_v3 = vld [vmem:[#allocation5 + $0x8] sm:$0xff]  ;;  %v44_v4 = vld [vmem:[#allocation5 + $0x10] sm:$0xff]  ;;  %v45_v6 = vld [vmem:[#allocation5 + $0x18] sm:$0xff]  ;;  %vm46_vm1 = vcmask 261120   ;;  %vm120_vm2 = vcmask 1041408   ;;  %s287_s13 = smov [#allocation7]  }
  0x28   :  { %v193_v5 = vpack.c.bf16 %v43_v3, %v42_v2  ;;  %v196_v7 = vpack.c.bf16 %v45_v6, %v44_v4  ;;  %v41_v8 = vld [vmem:[#allocation2] sm:$0x3]  ;;  %v149_v33 = vshrl.u32 %v148_v32, 7  ;;  %s165_s14 = sshll.u32 %s287_s13, 4  ;;  %s166_s14 = int_to_ptr.vmem [resolvable:$true] %s165_s14 }
  0x29   :  { %v141_v34 = vld [vmem:[%s359_s2] sm:$0x1]  ;;  %v145_v38 = vld [vmem:[%s359_s2 + $0x1] sm:$0x1]  ;;  %s252_s15 = scalar_lea.vmem %s166_s14, 32  ;;  %p257_p3 = scmp.lt.s32.totalorder %s166_s14, %s166_s14 }
  0x2a   :  { %194 = vmatpush3.bf16.msra.mxu0 %v193_v5  ;;  %v150_v35 = vsub.s32 0, %v149_v33  ;;  %p253_p2 = scmp.ne.s32.totalorder %s166_s14, %s252_s15  ;;  %p258_p4 = scmp.lt.s32.totalorder %s252_s15, %s252_s15 }
  0x2b   :  { %195 = vmatprep.subr.bf16.mxu0 %v284_v0 }
  0x2c   :  { %p259_p5 = por %p258_p4, %p257_p3 }
  0x2e   :  { %197 = vmatpush3.bf16.msra.mxu0 %v196_v7  ;;  %p260_p6 = pnand %p259_p5, %p253_p2 }
  0x31   :  { %190 = vmatmul.mubr.msk.f32.vlgmr.msra.gmra.mrb[0].mxu0 %vm46_vm1, %v41_v8 }
 0x104   :  { %v116_v9 = vpop.f32.mrb[0].mxu0 }
 0x105   :  { %v121_v10 = vsel %vm120_vm2, %v116_v9, 0.0  ;;  %v129_v11 = vmul.f32 %v116_v9, %v116_v9  ;;  %v191_v12 = vpop.f32.mrb[1].mxu0 }
 0x106   :  { %v122_v13 = vrot.slane %v121_v10, 4 }
 0x107   :  { %v130_v14 = vsel %vm120_vm2, %v129_v11, 0.0 }
 0x108   :  { %v123_v15 = vadd.f32 %v122_v13, %v121_v10  ;;  %v131_v16 = vrot.slane %v130_v14, 4 }
 0x10a   :  { %v124_v17 = vrot.slane %v123_v15, 2  ;;  %v132_v18 = vadd.f32 %v131_v16, %v130_v14 }
 0x10c   :  { %v125_v19 = vadd.f32 %v124_v17, %v123_v15  ;;  %v133_v20 = vrot.slane %v132_v18, 2 }
 0x10e   :  { %v126_v21 = vrot.slane %v125_v19, 1  ;;  %v134_v22 = vadd.f32 %v133_v20, %v132_v18 }
 0x110   :  { %v127_v23 = vadd.f32 %v126_v21, %v125_v19  ;;  %v135_v24 = vrot.slane %v134_v22, 1 }
 0x112   :  { %v128_v25 = vmul.f32 0.5, %v127_v23  ;;  %v136_v26 = vadd.f32 %v135_v24, %v134_v22 }
 0x114   :  { %v137_v27 = vmul.f32 0.5, %v136_v26  ;;  %v138_v28 = vmul.f32 %v128_v25, %v128_v25 }
 0x116   :  { %v139_v29 = vsub.f32 %v137_v27, %v138_v28 }
 0x118   :  { %v140_v30 = vmax.f32 %v139_v29, 0.0 }
 0x11a   :  { %v142_v31 = vadd.f32 1e-05, %v140_v30 }
 0x11c   :  { %206 = vrsqrt.f32 %v142_v31 }
 0x126   :  { %v207_v36 = vpop.eup %206 }
 0x127   :  { %v144_v37 = vmul.f32 %v207_v36, %v141_v34 }
 0x129   :  { %v146_v39 = vmul.f32 %v144_v37, %v128_v25  ;;  %v151_v40 = vrot.slane %v144_v37, %v150_v35 }
 0x12b   :  { %v147_v41 = vsub.f32 %v145_v38, %v146_v39  ;;  %v152_v42 = vmul.f32 %v151_v40, %v116_v9 }
 0x12d   :  { %v156_v43 = vrot.slane %v147_v41, %v150_v35 }
 0x12f   :  { %v157_v44 = vadd.f32 %v156_v43, %v152_v42 }
 0x131   :  { %158 = vst [vmem:[#allocation7] sm:$0x3] %v157_v44 }
 0x132   :  { %263 = shalt.err (!%p260_p6)
}
 0x133   :  { %s264_s2 = scalar_lea.hbm %s360_s3, 32 }
 0x134   :  { %p265_p7 = scmp.ne.s32.totalorder %s360_s3, %s264_s2  ;;  %p268_p8 = scmp.lt.u32.totalorder %s264_s2, %s360_s3 }
 0x136   :  { %p270_p9 = pnand %p268_p8, %p265_p7 }
 0x138   :  { %273 = shalt.err (!%p270_p9)
}
 0x139   :  { %168 = dma.vmem_to_hbm [thread:$0]  %s166_s14, 32, %s360_s3, [#allocation4]  }
 0x13a   :  { %278 = dma.done.wait [#allocation4], 32  }
 0x13b   :  { %279 = vsyncadd [#allocation4], 4294967264 }
 0x13c   :  { %172 = vsyncpa [#allocation3], 1 }
 0x13d   :  { %173 = vsyncpa [#allocation6], 1 }
 0x13e   :  { %174 = vsyncpa [#allocation4], 1 }

</bundles_post_ra>
